<compile_context>
chip_gen: v7x
topology: tpu7x:2x2x1
jax: 0.10.0
libtpu: 0.0.40
codegen_flags: <defaults>
</compile_context>

<pallas_src>
import numpy as np
import jax
import jax.numpy as jnp
from jax.experimental import pallas as pl
from jax.experimental.pallas import tpu as pltpu

# ----------------------------- configuration ------------------------------
SAMPLE_RATE = 2000
NFFT = 64
HOP = 32
NMELS = 16
FMIN = 20.0
FMAX = SAMPLE_RATE / 2.0
AMIN = 1e-10
NCH = 4
FBINS = NFFT // 2 + 1       # 33
FPAD = 64                   # Re / Im each zero-padded 33 -> 64 lanes
LANES = 2 * FPAD            # combined [Re | Im] layout = 128 lanes (one vreg)
KPAD = 128                  # frames K dim zero-padded 64 -> 128 (full-lane rows)
NMELS_PAD = 128             # fused output columns padded to a full lane width

TARGET_ROWS = 256           # fill the MXU M dimension per grid step
MAX_FRAME_ROWS = 2048       # per-step cap on NCH*bb*tt rows (VMEM sweet spot)


# --------------------------- parameter setup (glue) ------------------------
def slaney_mel_filterbank(sr, n_fft, n_mels, fmin, fmax):
    """librosa.filters.mel (htk=False, norm='slaney') re-implemented in numpy."""
    f_sp = 200.0 / 3
    min_log_hz = 1000.0
    min_log_mel = min_log_hz / f_sp
    logstep = np.log(6.4) / 27.0

    def hz_to_mel(f):
        f = np.atleast_1d(np.asarray(f, dtype=np.float64))
        mels = f / f_sp
        log_t = f >= min_log_hz
        mels[log_t] = min_log_mel + np.log(f[log_t] / min_log_hz) / logstep
        return mels

    def mel_to_hz(m):
        m = np.asarray(m, dtype=np.float64)
        freqs = f_sp * m
        log_t = m >= min_log_mel
        freqs[log_t] = min_log_hz * np.exp(logstep * (m[log_t] - min_log_mel))
        return freqs

    fftfreqs = np.linspace(0.0, sr / 2.0, n_fft // 2 + 1)
    mel_pts = mel_to_hz(np.linspace(hz_to_mel(fmin)[0], hz_to_mel(fmax)[0], n_mels + 2))
    fdiff = np.diff(mel_pts)
    ramps = mel_pts[:, None] - fftfreqs[None, :]
    weights = np.zeros((n_mels, n_fft // 2 + 1), dtype=np.float64)
    for i in range(n_mels):
        lower = -ramps[i] / fdiff[i]
        upper = ramps[i + 2] / fdiff[i + 1]
        weights[i] = np.maximum(0.0, np.minimum(lower, upper))
    enorm = 2.0 / (mel_pts[2:n_mels + 2] - mel_pts[:n_mels])
    weights *= enorm[:, None]
    return weights  # (n_mels, F)


def build_constants():
    n = np.arange(NFFT, dtype=np.float64)
    k = np.arange(FBINS, dtype=np.float64)
    window = 0.5 - 0.5 * np.cos(2.0 * np.pi * n / NFFT)     # periodic hann
    ang = 2.0 * np.pi * np.outer(n, k) / NFFT               # (NFFT, F)

    # Combined windowed DFT basis; K zero-padded 64 -> 128 rows so the frames
    # LHS rows are full 128-lane (unmasked loads feeding the MXU).
    # Columns [0:FBINS) -> Re, [FPAD:FPAD+FBINS) -> Im.
    dft = np.zeros((KPAD, LANES), dtype=np.float64)
    dft[:NFFT, :FBINS] = window[:, None] * np.cos(ang)             # Re[k]
    dft[:NFFT, FPAD:FPAD + FBINS] = window[:, None] * (-np.sin(ang))  # Im[k]

    mel_fb = slaney_mel_filterbank(SAMPLE_RATE, NFFT, NMELS, FMIN, FMAX).T   # (F, n_mels)

    # Fused RHS (128, 128):
    #   columns [0, 16): mel weights duplicated over the Re/Im halves, so
    #                    (stft*stft) @ rhs == (re^2 + im^2) @ melW,
    #   columns [16,32): irfft (norm="backward") basis restricted to the
    #                    n_mels centre lags of GCC-PHAT.
    rhs = np.zeros((LANES, NMELS_PAD), dtype=np.float64)
    rhs[:FBINS, :NMELS] = mel_fb
    rhs[FPAD:FPAD + FBINS, :NMELS] = mel_fb

    lags = np.concatenate([np.arange(NFFT - NMELS // 2, NFFT),
                           np.arange(0, NMELS // 2)]).astype(np.float64)     # (n_mels,)
    wk = np.full((FBINS,), 2.0)
    wk[0] = 1.0
    wk[-1] = 1.0
    phase = 2.0 * np.pi * np.outer(k, lags) / NFFT            # (F, n_mels)
    rhs[:FBINS, NMELS:2 * NMELS] = (wk[:, None] / NFFT) * np.cos(phase)
    rhs[FPAD:FPAD + FBINS, NMELS:2 * NMELS] = -(wk[:, None] / NFFT) * np.sin(phase)

    return (jnp.asarray(dft, jnp.float32), jnp.asarray(rhs, jnp.float32),
            jnp.asarray(mel_fb, jnp.float32))


# ------------------------------ grid planning -------------------------------
def _plan_grid(B, T):
    """Return (bb, tt, t_pad, gb, gt): bb batch items x tt frames per grid step."""
    t_pad = -(-T // 8) * 8                       # sublane-align the frame count
    if NCH * t_pad > MAX_FRAME_ROWS:
        # Long-signal path: tile over time (one batch element per step).
        tt = (MAX_FRAME_ROWS // NCH) // 8 * 8
        t_pad = -(-T // tt) * tt
        return 1, tt, t_pad, B, t_pad // tt
    rows = NCH * t_pad
    divisors = [d for d in range(1, B + 1) if B % d == 0]
    # Prefer hitting TARGET_ROWS while keeping >= 2 grid steps (v7x dual TC)...
    cands = [d for d in divisors if d * rows >= TARGET_ROWS and B // d >= 2]
    if not cands:
        # ...else hit the target even if the grid collapses to a single step...
        cands = [d for d in divisors if d * rows >= TARGET_ROWS]
    # ...else the whole problem is below the target: fold everything into one
    # step (per-step pipeline overhead dominates at toy sizes).
    bb = min(cands) if cands else B
    return bb, t_pad, t_pad, B // bb, 1


# ------------------------------- Pallas kernel ------------------------------
def _logmel_gcc_kernel(frames_ref, dft_ref, rhs_ref, out_ref):
    rows = frames_ref.shape[0]        # NCH * bb * tt, rows ordered (chan, batch, frame)
    bt = rows // NCH                  # bb * tt frames for the channel-0/1 gcc pair
    log10_scale = np.float32(10.0 / np.log(10.0))

    # --- one STFT matmul for every channel / sub-batch / frame of this step ---
    stft = jnp.dot(frames_ref[...], dft_ref[...],
                   preferred_element_type=jnp.float32)            # (rows, 128) [Re|Im]
    sq = stft * stft

    # --- GCC-PHAT between channels 0 and 1 (stay in the [Re|Im] lane layout) --
    s0 = stft[:bt, :]                       # channel 0 rows: [re0 | im0]
    s1 = stft[bt:2 * bt, :]                 # channel 1 rows: [re1 | im1]
    a = s0 * s1                                         # [re0*re1 | im0*im1]
    b = s0 * pltpu.roll(s1, FPAD, axis=1)               # [re0*im1 | im0*re1]
    r_re = a + pltpu.roll(a, FPAD, axis=1)              # Re(X0*conj(X1)) in every lane
    r_sw = b - pltpu.roll(b, FPAD, axis=1)              # [-Im(R) | +Im(R)]
    lane = jax.lax.broadcasted_iota(jnp.int32, (bt, LANES), 1)
    is_re = lane < FPAD
    comb = jnp.where(is_re, r_re, r_sw)                 # [Re(R) | Im(R)]
    msq = r_re * r_re + r_sw * r_sw                     # |R|^2 in every lane
    nz = msq > 0.0
    inv = jax.lax.rsqrt(jnp.where(nz, msq, 1.0))        # rsqrt+mul instead of sqrt+div
    phat = jnp.where(nz, comb * inv, jnp.where(is_re, 1.0, 0.0))  # exp(i*angle(R))

    # --- ONE fused output matmul (mel in cols 0:16, irfft basis in cols 16:32) -
    lhs = jnp.concatenate([sq, phat], axis=0)                         # (rows+bt, 128)
    fused = jnp.dot(lhs, rhs_ref[...], preferred_element_type=jnp.float32)
    logv = log10_scale * jnp.log(jnp.maximum(fused, np.float32(AMIN)))
    row_id = jax.lax.broadcasted_iota(jnp.int32, fused.shape, 0)
    # log10 only applies to the mel (power) rows; gcc rows pass through.
    out_ref[...] = jnp.where(row_id < rows, logv, fused)              # one full-tile store


# ------------------------------- host wrapper -------------------------------
def logmel_intensity_extractor(x, dft_basis, fused_basis):
    """x: (B, 4, L) float32 waveform -> (B, 5, T, n_mels) float32."""
    B, C, L = x.shape
    assert C == NCH
    pad = NFFT // 2
    T = L // HOP + 1
    bb, tt, t_pad, gb, gt = _plan_grid(B, T)
    G = gb * gt
    rows_in = NCH * bb * tt          # LHS rows per grid step
    rows_out = 5 * bb * tt           # 4*bb*tt logmel rows + bb*tt gcc rows

    # Glue: center=True reflect padding + framing (no gather when hop == nfft/2).
    xp = jnp.pad(x, ((0, 0), (0, 0), (pad, pad)), mode="reflect")
    if L % HOP == 0:
        halves = xp.reshape(B, C, (L + NFFT) // HOP, HOP)                 # (B,C,T+1,HOP)
        frames = jnp.concatenate([halves[:, :, :T, :], halves[:, :, 1:T + 1, :]], axis=-1)
    else:
        idx = np.arange(T)[:, None] * HOP + np.arange(NFFT)[None, :]      # (T, NFFT)
        frames = xp[:, :, idx]
    # Pad time to the tile multiple, re-group rows into per-grid-step order
    # (gb, gt, channel, sub_batch, frame), then zero-pad K to a full 128 lanes.
    frames = jnp.pad(frames, ((0, 0), (0, 0), (0, t_pad - T), (0, 0)))
    frames = frames.reshape(gb, bb, NCH, gt, tt, NFFT).transpose(0, 3, 2, 1, 4, 5)
    frames = frames.reshape(G * rows_in, NFFT)
    frames = jnp.pad(frames, ((0, 0), (0, KPAD - NFFT)))

    out_k = pl.pallas_call(
        _logmel_gcc_kernel,
        out_shape=jax.ShapeDtypeStruct((G * rows_out, NMELS_PAD), jnp.float32),
        grid=(G,),
        in_specs=[
            pl.BlockSpec((rows_in, KPAD), lambda g: (g, 0)),
            pl.BlockSpec((KPAD, LANES), lambda g: (0, 0)),
            pl.BlockSpec((LANES, NMELS_PAD), lambda g: (0, 0)),
        ],
        out_specs=pl.BlockSpec((rows_out, NMELS_PAD), lambda g: (g, 0)),
        compiler_params=pltpu.CompilerParams(dimension_semantics=("parallel",)),
        cost_estimate=pl.CostEstimate(
            flops=int(2 * G * rows_in * KPAD * LANES
                      + 2 * G * rows_out * LANES * NMELS_PAD),
            transcendentals=int(G * rows_out * NMELS_PAD + G * (rows_out - rows_in) * LANES),
            bytes_accessed=int(4 * (G * rows_in * KPAD + G * rows_out * NMELS_PAD
                                    + KPAD * LANES + LANES * NMELS_PAD)),
        ),
    )(frames, dft_basis, fused_basis)

    # Untangle the per-step row layout: first 4*bb*tt rows are logmel (cols 0:16,
    # ordered (chan, sub_batch, frame)), last bb*tt rows are gcc (cols 16:32).
    blk = out_k.reshape(gb, gt, rows_out, NMELS_PAD)
    mel = blk[:, :, :rows_in, :NMELS].reshape(gb, gt, NCH, bb, tt, NMELS)
    mel = mel.transpose(0, 3, 2, 1, 4, 5).reshape(B, NCH, t_pad, NMELS)[:, :, :T]
    gcc = blk[:, :, rows_in:, NMELS:2 * NMELS].reshape(gb, gt, bb, tt, NMELS)
    gcc = gcc.transpose(0, 2, 1, 3, 4).reshape(B, 1, t_pad, NMELS)[:, :, :T]
    return jnp.concatenate([mel, gcc], axis=1)


# ------------------------------ pure-JAX reference --------------------------
def reference_forward(x, mel_fb):
    B, C, L = x.shape
    pad = NFFT // 2
    T = L // HOP + 1
    xp = jnp.pad(x, ((0, 0), (0, 0), (pad, pad)), mode="reflect")
    idx = np.arange(T)[:, None] * HOP + np.arange(NFFT)[None, :]
    n = np.arange(NFFT)
    window = jnp.asarray(0.5 - 0.5 * np.cos(2.0 * np.pi * n / NFFT), jnp.float32)
    frames = xp[:, :, idx] * window                                 # (B,C,T,NFFT)
    k = np.arange(FBINS)
    ang = jnp.asarray(2.0 * np.pi * np.outer(n, k) / NFFT, jnp.float32)
    re = jnp.einsum("bctn,nf->bctf", frames, jnp.cos(ang), precision="highest")
    im = jnp.einsum("bctn,nf->bctf", frames, -jnp.sin(ang), precision="highest")
    power = re ** 2 + im ** 2
    mel = jnp.einsum("bctf,fm->bctm", power, mel_fb, precision="highest")
    logmel = 10.0 * jnp.log10(jnp.maximum(mel, AMIN))
    X0 = re[:, 0] + 1j * im[:, 0]
    X1 = re[:, 1] + 1j * im[:, 1]
    R = X0 * jnp.conj(X1)
    P = jnp.exp(1j * jnp.angle(R))
    g = jnp.fft.irfft(P, n=NFFT, axis=-1)
    gcc = jnp.concatenate([g[..., -NMELS // 2:], g[..., :NMELS // 2]], axis=-1)
    return jnp.concatenate([logmel, gcc[:, None]], axis=1).astype(jnp.float32)


# ----------------------------------- main -----------------------------------
if __name__ == "__main__":
    dft_basis, fused_basis, mel_fb = build_constants()
    fwd = jax.jit(lambda x: logmel_intensity_extractor(x, dft_basis, fused_basis))

    key = jax.random.PRNGKey(0)
    cases = [
        (2, 224),      # toy: whole batch folded into a single grid step
        (16, 224),     # batch-folded: 256-row matmuls, 2 parallel steps (v7x)
        (1, 20000),    # long signal: time-tiled grid with padded frame count
    ]
    for (B, L) in cases:
        key, sub = jax.random.split(key)
        x = jax.random.normal(sub, (B, NCH, L), dtype=jnp.float32)

        out = jax.block_until_ready(fwd(x))
        T = L // HOP + 1
        assert out.shape == (B, 5, T, NMELS), out.shape
        assert out.dtype == jnp.float32

        ref = jax.block_until_ready(reference_forward(x, mel_fb))
        np.testing.assert_allclose(np.asarray(out), np.asarray(ref), rtol=5e-3, atol=5e-3)

    print("KERNEL_OK")
</pallas_src>

<mosaic_0001>
module attributes {stable_mosaic.version = 11 : i64} {
  func.func @_logmel_gcc_kernel(%arg0: i32, %arg1: memref<64x128xf32, #tpu.memory_space<vmem>>, %arg2: memref<128x128xf32, #tpu.memory_space<vmem>>, %arg3: memref<128x128xf32, #tpu.memory_space<vmem>>, %arg4: memref<80x128xf32, #tpu.memory_space<vmem>>) attributes {dimension_semantics = [#tpu.dimension_semantics<parallel>], iteration_bounds = array<i64: 1>, scalar_prefetch = 0 : i64, scratch_operands = 0 : i64, tpu.core_type = #tpu.core_type<tc>, window_params = [{transform_indices = @transform_0, window_bounds = array<i64: 64, 128>}, {pipeline_mode = #tpu.pipeline_mode<synchronous>, transform_indices = @transform_1, window_bounds = array<i64: 128, 128>}, {pipeline_mode = #tpu.pipeline_mode<synchronous>, transform_indices = @transform_2, window_bounds = array<i64: 128, 128>}, {transform_indices = @transform_3, window_bounds = array<i64: 80, 128>}]} {
    %c0 = arith.constant 0 : index
    %c0_0 = arith.constant 0 : index
    %0 = vector.load %arg1[%c0, %c0_0] : memref<64x128xf32, #tpu.memory_space<vmem>>, vector<64x128xf32>
    %c0_1 = arith.constant 0 : index
    %c0_2 = arith.constant 0 : index
    %1 = vector.load %arg2[%c0_1, %c0_2] : memref<128x128xf32, #tpu.memory_space<vmem>>, vector<128x128xf32>
    %cst = arith.constant dense<0.000000e+00> : vector<64x128xf32>
    %2 = tpu.matmul %0, %1, %cst {dimension_numbers = #tpu.dot_dimension_numbers<[1], [0], [0], [1], [0, 0, 1, 1], [], []>} : vector<64x128xf32>, vector<128x128xf32>, vector<64x128xf32> -> vector<64x128xf32>
    %3 = arith.mulf %2, %2 : vector<64x128xf32>
    %4 = vector.extract_strided_slice %2 {offsets = [0, 0], sizes = [16, 128], strides = [1, 1]} : vector<64x128xf32> to vector<16x128xf32>
    %5 = vector.extract_strided_slice %2 {offsets = [16, 0], sizes = [16, 128], strides = [1, 1]} : vector<64x128xf32> to vector<16x128xf32>
    %6 = arith.mulf %4, %5 : vector<16x128xf32>
    %c64_i32 = arith.constant 64 : i32
    %7 = tpu.dynamic_rotate %5 by %c64_i32 dim 1 : vector<16x128xf32>, i32 -> vector<16x128xf32>
    %8 = arith.mulf %4, %7 : vector<16x128xf32>
    %c64_i32_3 = arith.constant 64 : i32
    %9 = tpu.dynamic_rotate %6 by %c64_i32_3 dim 1 : vector<16x128xf32>, i32 -> vector<16x128xf32>
    %10 = arith.addf %6, %9 : vector<16x128xf32>
    %c64_i32_4 = arith.constant 64 : i32
    %11 = tpu.dynamic_rotate %8 by %c64_i32_4 dim 1 : vector<16x128xf32>, i32 -> vector<16x128xf32>
    %12 = arith.subf %8, %11 : vector<16x128xf32>
    %13 = tpu.iota {dimensions = array<i32: 1>} : vector<16x128xi32>
    %c64_i32_5 = arith.constant 64 : i32
    %14 = vector.broadcast %c64_i32_5 : i32 to vector<16x128xi32>
    %15 = arith.cmpi slt, %13, %14 : vector<16x128xi32>
    %16 = arith.select %15, %10, %12 : vector<16x128xi1>, vector<16x128xf32>
    %17 = arith.mulf %10, %10 : vector<16x128xf32>
    %18 = arith.mulf %12, %12 : vector<16x128xf32>
    %19 = arith.addf %17, %18 : vector<16x128xf32>
    %cst_6 = arith.constant 0.000000e+00 : f32
    %20 = vector.broadcast %cst_6 : f32 to vector<16x128xf32>
    %21 = arith.cmpf ogt, %19, %20 : vector<16x128xf32>
    %cst_7 = arith.constant 1.000000e+00 : f32
    %22 = vector.broadcast %cst_7 : f32 to vector<16x128xf32>
    %23 = arith.select %21, %19, %22 : vector<16x128xi1>, vector<16x128xf32>
    %24 = math.rsqrt %23 : vector<16x128xf32>
    %25 = arith.mulf %16, %24 : vector<16x128xf32>
    %cst_8 = arith.constant 1.000000e+00 : f32
    %cst_9 = arith.constant 0.000000e+00 : f32
    %26 = vector.broadcast %cst_8 : f32 to vector<16x128xf32>
    %27 = vector.broadcast %cst_9 : f32 to vector<16x128xf32>
    %28 = arith.select %15, %26, %27 : vector<16x128xi1>, vector<16x128xf32>
    %29 = arith.select %21, %25, %28 : vector<16x128xi1>, vector<16x128xf32>
    %30 = tpu.concatenate %3, %29 in 0 : vector<64x128xf32>, vector<16x128xf32> -> vector<80x128xf32>
    %c0_10 = arith.constant 0 : index
    %c0_11 = arith.constant 0 : index
    %31 = vector.load %arg3[%c0_10, %c0_11] : memref<128x128xf32, #tpu.memory_space<vmem>>, vector<128x128xf32>
    %cst_12 = arith.constant dense<0.000000e+00> : vector<80x128xf32>
    %32 = tpu.matmul %30, %31, %cst_12 {dimension_numbers = #tpu.dot_dimension_numbers<[1], [0], [0], [1], [0, 0, 1, 1], [], []>} : vector<80x128xf32>, vector<128x128xf32>, vector<80x128xf32> -> vector<80x128xf32>
    %cst_13 = arith.constant 1.000000e-10 : f32
    %33 = vector.broadcast %cst_13 : f32 to vector<80x128xf32>
    %34 = arith.maximumf %32, %33 : vector<80x128xf32>
    %35 = math.log %34 : vector<80x128xf32>
    %cst_14 = arith.constant 4.34294462 : f32
    %36 = vector.broadcast %cst_14 : f32 to vector<80x128xf32>
    %37 = arith.mulf %36, %35 : vector<80x128xf32>
    %38 = tpu.iota {dimensions = array<i32: 0>} : vector<80x128xi32>
    %c64_i32_15 = arith.constant 64 : i32
    %39 = vector.broadcast %c64_i32_15 : i32 to vector<80x128xi32>
    %40 = arith.cmpi slt, %38, %39 : vector<80x128xi32>
    %41 = arith.select %40, %37, %32 : vector<80x128xi1>, vector<80x128xf32>
    %c0_16 = arith.constant 0 : index
    %c0_17 = arith.constant 0 : index
    %42 = vector.load %arg4[%c0_16, %c0_17] : memref<80x128xf32, #tpu.memory_space<vmem>>, vector<80x128xf32>
    tpu.vector_store %arg4[%c0_16, %c0_17], %41 {strides = array<i32>} : memref<80x128xf32, #tpu.memory_space<vmem>>, vector<80x128xf32>,
    return
  }
  func.func @transform_0(%arg0: i32) -> (i32, i32) {
    %c0_i32 = arith.constant 0 : i32
    %c0_i32_0 = arith.constant 0 : i32
    return %arg0, %c0_i32 : i32, i32
  }
  func.func @transform_1(%arg0: i32) -> (i32, i32) {
    %c0_i32 = arith.constant 0 : i32
    %c0_i32_0 = arith.constant 0 : i32
    %c0_i32_1 = arith.constant 0 : i32
    return %c0_i32, %c0_i32_0 : i32, i32
  }
  func.func @transform_2(%arg0: i32) -> (i32, i32) {
    %c0_i32 = arith.constant 0 : i32
    %c0_i32_0 = arith.constant 0 : i32
    %c0_i32_1 = arith.constant 0 : i32
    return %c0_i32, %c0_i32_0 : i32, i32
  }
  func.func @transform_3(%arg0: i32) -> (i32, i32) {
    %c0_i32 = arith.constant 0 : i32
    %c0_i32_0 = arith.constant 0 : i32
    return %arg0, %c0_i32 : i32, i32
  }
}

</mosaic_0001>

<bundles_post_ra>
// kernel: _lambda_.1
= control target key start
LH: loop header
LB: loop body
LE: loop exit
PB: predicated region body
PF: predicated region fallthrough
CT: control target
= control target key end

     0   :  { %s636_s9 = smov 64   ;;  %s812_s1 = inlined_call_operand.vmem [shape: f32[128,128], index: 1, kind: input, shape index: {}]   ;;  %s813_s0 = inlined_call_operand.vmem [shape: f32[64,128], index: 0, kind: input, shape index: {}]   ;;  %s814_s2 = inlined_call_operand.vmem [shape: f32[128,128], index: 2, kind: input, shape index: {}]   ;;  %s815_s3 = inlined_call_operand.vmem [shape: f32[80,128], index: 3, kind: output, shape index: {}]  }
   0x1   :  { %v22_v0 = vld [vmem:[%s812_s1] sm:$0xff]  ;;  %v23_v1 = vld [vmem:[%s812_s1 + $0x8] sm:$0xff]  ;;  %v24_v2 = vld [vmem:[%s812_s1 + $0x10] sm:$0xff] }
   0x2   :  { %v550_v3 = vpack.c.bf16 %v23_v1, %v22_v0  ;;  %v25_v4 = vld [vmem:[%s812_s1 + $0x18] sm:$0xff]  ;;  %v26_v6 = vld [vmem:[%s812_s1 + $0x20] sm:$0xff]  ;;  %v27_v7 = vld [vmem:[%s812_s1 + $0x28] sm:$0xff] }
   0x3   :  { %v554_v5 = vpack.c.bf16 %v25_v4, %v24_v2  ;;  %v558_v8 = vpack.c.bf16 %v27_v7, %v26_v6  ;;  %v14_v9 = vld [vmem:[%s813_s0] sm:$0xff]  ;;  %v28_v10 = vld [vmem:[%s812_s1 + $0x30] sm:$0xff]  ;;  %v29_v11 = vld [vmem:[%s812_s1 + $0x38] sm:$0xff] }
   0x4   :  { %551 = vmatprep.subr.bf16.mxu0 %v550_v3  ;;  %491 = vmatprep.mubr.f32.mxu0 %v14_v9  ;;  %v193_v12 = vld [vmem:[%s814_s2] sm:$0xff]  ;;  %v194_v13 = vld [vmem:[%s814_s2 + $0x8] sm:$0xff]  ;;  %v195_v14 = vld [vmem:[%s814_s2 + $0x10] sm:$0xff]  ;;  %v562_v18 = vpack.c.bf16 %v29_v11, %v28_v10 }
   0x5   :  { %553 = vmatpush3.bf16.msra.mxu0 %v550_v3  ;;  %v196_v15 = vld [vmem:[%s814_s2 + $0x18] sm:$0xff]  ;;  %v582_v16 = vpack.c.bf16 %v194_v13, %v193_v12  ;;  %v197_v19 = vld [vmem:[%s814_s2 + $0x20] sm:$0xff]  ;;  %v198_v20 = vld [vmem:[%s814_s2 + $0x28] sm:$0xff] }
   0x6   :  { %555 = vmatprep.subr.bf16.mxu0 %v554_v5  ;;  %v586_v17 = vpack.c.bf16 %v196_v15, %v195_v14  ;;  %v30_v21 = vld [vmem:[%s812_s1 + $0x40] sm:$0xff]  ;;  %v31_v22 = vld [vmem:[%s812_s1 + $0x48] sm:$0xff]  ;;  %v590_v23 = vpack.c.bf16 %v198_v20, %v197_v19  ;;  %v199_v25 = vld [vmem:[%s814_s2 + $0x30] sm:$0xff] }
   0x7   :  { %583 = vmatprep.subr.bf16.mxu1 %v582_v16  ;;  %v566_v24 = vpack.c.bf16 %v31_v22, %v30_v21  ;;  %v200_v26 = vld [vmem:[%s814_s2 + $0x38] sm:$0xff]  ;;  %v32_v27 = vld [vmem:[%s812_s1 + $0x50] sm:$0xff]  ;;  %v201_v31 = vld [vmem:[%s814_s2 + $0x40] sm:$0xff] }
   0x8   :  { %585 = vmatpush3.bf16.msra.mxu1 %v582_v16  ;;  %v33_v28 = vld [vmem:[%s812_s1 + $0x58] sm:$0xff]  ;;  %v594_v29 = vpack.c.bf16 %v200_v26, %v199_v25  ;;  %v202_v32 = vld [vmem:[%s814_s2 + $0x48] sm:$0xff]  ;;  %v34_v33 = vld [vmem:[%s812_s1 + $0x60] sm:$0xff] }
   0x9   :  { %557 = vmatpush3.bf16.msra.mxu0 %v554_v5  ;;  %587 = vmatprep.subr.bf16.mxu1 %v586_v17  ;;  %v570_v30 = vpack.c.bf16 %v33_v28, %v32_v27  ;;  %v35_v34 = vld [vmem:[%s812_s1 + $0x68] sm:$0xff]  ;;  %v598_v35 = vpack.c.bf16 %v202_v32, %v201_v31  ;;  %v203_v37 = vld [vmem:[%s814_s2 + $0x50] sm:$0xff]  ;;  %v204_v38 = vld [vmem:[%s814_s2 + $0x58] sm:$0xff] }
   0xa   :  { %559 = vmatprep.subr.bf16.mxu0 %v558_v8  ;;  %v574_v36 = vpack.c.bf16 %v35_v34, %v34_v33  ;;  %v36_v39 = vld [vmem:[%s812_s1 + $0x70] sm:$0xff]  ;;  %v37_v40 = vld [vmem:[%s812_s1 + $0x78] sm:$0xff]  ;;  %v602_v41 = vpack.c.bf16 %v204_v38, %v203_v37  ;;  %v205_v43 = vld [vmem:[%s814_s2 + $0x60] sm:$0xff] }
   0xb   :  { %v578_v42 = vpack.c.bf16 %v37_v40, %v36_v39  ;;  %v206_v44 = vld [vmem:[%s814_s2 + $0x68] sm:$0xff]  ;;  %v16_v47 = vld [vmem:[%s813_s0 + $0x10] sm:$0xff]  ;;  %v17_v48 = vld [vmem:[%s813_s0 + $0x18] sm:$0xff] }
   0xc   :  { %589 = vmatpush3.bf16.msra.mxu1 %v586_v17  ;;  %v606_v45 = vpack.c.bf16 %v206_v44, %v205_v43  ;;  %v15_v46 = vld [vmem:[%s813_s0 + $0x8] sm:$0xff]  ;;  %v207_v49 = vld [vmem:[%s814_s2 + $0x70] sm:$0xff]  ;;  %v208_v50 = vld [vmem:[%s814_s2 + $0x78] sm:$0xff] }
   0xd   :  { %561 = vmatpush3.bf16.msra.mxu0 %v558_v8  ;;  %591 = vmatprep.subr.bf16.mxu1 %v590_v23  ;;  %v610_v51 = vpack.c.bf16 %v208_v50, %v207_v49  ;;  %v18_v52 = vld [vmem:[%s813_s0 + $0x20] sm:$0xff]  ;;  %v19_v53 = vld [vmem:[%s813_s0 + $0x28] sm:$0xff]  ;;  %v20_v54 = vld [vmem:[%s813_s0 + $0x30] sm:$0xff] }
   0xe   :  { %563 = vmatprep.subr.bf16.mxu0 %v562_v18  ;;  %v21_v55 = vld [vmem:[%s813_s0 + $0x38] sm:$0xff] }
  0x10   :  { %593 = vmatpush3.bf16.msra.mxu1 %v590_v23 }
  0x11   :  { %565 = vmatpush3.bf16.msra.mxu0 %v562_v18  ;;  %595 = vmatprep.subr.bf16.mxu1 %v594_v29 }
  0x12   :  { %567 = vmatprep.subr.bf16.mxu0 %v566_v24 }
  0x14   :  { %597 = vmatpush3.bf16.msra.mxu1 %v594_v29 }
  0x15   :  { %569 = vmatpush3.bf16.msra.mxu0 %v566_v24  ;;  %599 = vmatprep.subr.bf16.mxu1 %v598_v35 }
  0x16   :  { %571 = vmatprep.subr.bf16.mxu0 %v570_v30 }
  0x18   :  { %601 = vmatpush3.bf16.msra.mxu1 %v598_v35 }
  0x19   :  { %573 = vmatpush3.bf16.msra.mxu0 %v570_v30  ;;  %603 = vmatprep.subr.bf16.mxu1 %v602_v41 }
  0x1a   :  { %575 = vmatprep.subr.bf16.mxu0 %v574_v36 }
  0x1c   :  { %605 = vmatpush3.bf16.msra.mxu1 %v602_v41 }
  0x1d   :  { %577 = vmatpush3.bf16.msra.mxu0 %v574_v36  ;;  %607 = vmatprep.subr.bf16.mxu1 %v606_v45 }
  0x1e   :  { %579 = vmatprep.subr.bf16.mxu0 %v578_v42 }
  0x20   :  { %609 = vmatpush3.bf16.msra.mxu1 %v606_v45 }
  0x21   :  { %581 = vmatpush3.bf16.msra.mxu0 %v578_v42  ;;  %611 = vmatprep.subr.bf16.mxu1 %v610_v51 }
  0x24   :  { %492 = vmatmul.mubr.f32.vlgmr.msra.gmra.mrb[0].mxu0 %v15_v46  ;;  %613 = vmatpush3.bf16.msra.mxu1 %v610_v51 }
  0x25   :  { %494 = vmatprep.mubr.f32.mxu0 %v16_v47  ;;  %v171_v47 = vlaneseq }
  0x27   :  { %v172_v50 = vand.u32 127, %v171_v47 }
  0x28   :  { %495 = vmatmul.mubr.f32.gmra.mrb[2].mxu0 %v17_v48 }
  0x29   :  { %497 = vmatprep.mubr.f32.mxu0 %v18_v52  ;;  %vm173_vm2 = vcmp.lt.s32.totalorder %v172_v50, 64 }
  0x2c   :  { %498 = vmatmul.mubr.f32.gmra.mrb[4].mxu0 %v19_v53 }
  0x2d   :  { %500 = vmatprep.mubr.f32.mxu0 %v20_v54  ;;  %v637_v54 = vmov 0.0  }
  0x30   :  { %501 = vmatmul.mubr.f32.gmra.mrb[6].mxu0 %v21_v55  ;;  %v190_v55 = vsel %vm173_vm2, 1.0, %v637_v54 }
  0xf7   :  { %v493_v56 = vpop.f32.mrb[0].mxu0 }
  0xf8   :  { %v104_v57 = vpop.f32.mrb[1].mxu0  ;;  %v144_v59 = vmul.f32 %v493_v56, %v493_v56 }
  0xf9   :  { %v143_v58 = vmul.f32 %v104_v57, %v104_v57 }
  0xfb   :  { %v496_v60 = vpop.f32.mrb[2].mxu0  ;;  %535 = vmatprep.mubr.f32.mxu1 %v143_v58 }
  0xfc   :  { %v778_v61 = vmul.f32 %v496_v60, %v493_v56  ;;  %v114_v62 = vpop.f32.mrb[3].mxu0  ;;  %536 = vmatmul.mubr.f32.vlgmr.msra.gmra.mrb[0].mxu1 %v144_v59  ;;  %v146_v1 = vmul.f32 %v496_v60, %v496_v60 }
  0xfd   :  { %v145_v63 = vmul.f32 %v114_v62, %v114_v62  ;;  %153 = vrot.lane.b32.xlu0 %v114_v62, %s636_s9  ;;  %v151_v0 = vmul.f32 %v114_v62, %v104_v57 }
  0xff   :  { %159 = vrot.lane.b32.xlu1 %v151_v0, %s636_s9  ;;  %538 = vmatprep.mubr.f32.mxu1 %v145_v63  ;;  %v499_v2 = vpop.f32.mrb[4].mxu0 }
 0x100   :  { %539 = vmatmul.mubr.f32.gmra.mrb[2].mxu1 %v146_v1  ;;  %v124_v3 = vpop.f32.mrb[5].mxu0  ;;  %v148_v5 = vmul.f32 %v499_v2, %v499_v2 }
 0x101   :  { %155 = vrot.lane.b32.xlu0 %v496_v60, %s636_s9  ;;  %v147_v4 = vmul.f32 %v124_v3, %v124_v3 }
 0x103   :  { %v502_v6 = vpop.f32.mrb[6].mxu0  ;;  %541 = vmatprep.mubr.f32.mxu1 %v147_v4 }
 0x104   :  { %v134_v7 = vpop.f32.mrb[7].mxu0  ;;  %542 = vmatmul.mubr.f32.gmra.mrb[4].mxu1 %v148_v5  ;;  %v150_v9 = vmul.f32 %v502_v6, %v502_v6 }
 0x105   :  { %161 = vrot.lane.b32.xlu0 %v778_v61, %s636_s9  ;;  %v149_v8 = vmul.f32 %v134_v7, %v134_v7 }
 0x107   :  { %544 = vmatprep.mubr.f32.mxu1 %v149_v8 }
 0x108   :  { %545 = vmatmul.mubr.f32.gmra.mrb[6].mxu1 %v150_v9 }
 0x16f   :  { %v154_v10 = vpop.permute.xlu0 %153 }
 0x170   :  { %v157_v11 = vmul.f32 %v154_v10, %v104_v57 }
 0x171   :  { %v160_v28 = vpop.permute.xlu1 %159 }
 0x172   :  { %165 = vrot.lane.b32.xlu1 %v157_v11, %s636_s9  ;;  %v163_v33 = vadd.f32 %v160_v28, %v151_v0 }
 0x173   :  { %v156_v12 = vpop.permute.xlu0 %155 }
 0x174   :  { %v158_v13 = vmul.f32 %v493_v56, %v156_v12  ;;  %v176_v39 = vmul.f32 %v163_v33, %v163_v33 }
 0x176   :  { %167 = vrot.lane.b32.xlu1 %v158_v13, %s636_s9 }
 0x177   :  { %v162_v35 = vpop.permute.xlu0 %161 }
 0x178   :  { %v164_v40 = vadd.f32 %v162_v35, %v778_v61 }
 0x17a   :  { %v177_v45 = vmul.f32 %v164_v40, %v164_v40 }
 0x1cf   :  { %v537_v14 = vpop.f32.mrb[0].mxu1 }
 0x1d0   :  { %v325_v15 = vmax.f32 %v537_v14, 1e-10  ;;  %v275_v16 = vpop.f32.mrb[1].mxu1 }
 0x1d1   :  { %v324_v17 = vmax.f32 %v275_v16, 1e-10 }
 0x1d2   :  { %616 = vlog2.f32 %v325_v15 }
 0x1d3   :  { %618 = vlog2.f32 %v324_v17  ;;  %v540_v18 = vpop.f32.mrb[2].mxu1 }
 0x1d4   :  { %v327_v19 = vmax.f32 %v540_v18, 1e-10  ;;  %v285_v20 = vpop.f32.mrb[3].mxu1 }
 0x1d5   :  { %v326_v21 = vmax.f32 %v285_v20, 1e-10 }
 0x1d6   :  { %620 = vlog2.f32 %v327_v19 }
 0x1d7   :  { %622 = vlog2.f32 %v326_v21  ;;  %v543_v62 = vpop.f32.mrb[4].mxu1 }
 0x1d8   :  { %v329_v63 = vmax.f32 %v543_v62, 1e-10  ;;  %v295_v0 = vpop.f32.mrb[5].mxu1 }
 0x1d9   :  { %v328_v1 = vmax.f32 %v295_v0, 1e-10 }
 0x1db   :  { %v546_v2 = vpop.f32.mrb[6].mxu1 }
 0x1dc   :  { %v617_v22 = vpop.eup %616  ;;  %v331_v3 = vmax.f32 %v546_v2, 1e-10  ;;  %v305_v4 = vpop.f32.mrb[7].mxu1 }
 0x1dd   :  { %v619_v23 = vpop.eup %618  ;;  %v337_v24 = vmul.f32 0.6931472, %v617_v22  ;;  %v330_v5 = vmax.f32 %v305_v4, 1e-10 }
 0x1de   :  { %v335_v25 = vmul.f32 0.6931472, %v619_v23 }
 0x1df   :  { %v355_v26 = vmul.f32 4.3429446, %v337_v24 }
 0x1e0   :  { %v621_v27 = vpop.eup %620  ;;  %v354_v29 = vmul.f32 4.3429446, %v335_v25 }
 0x1e1   :  { %v623_v30 = vpop.eup %622  ;;  %396 = vst [vmem:[%s815_s3 + $0x8] sm:$0xff] %v355_v26  ;;  %v341_v31 = vmul.f32 0.6931472, %v621_v27 }
 0x1e2   :  { %395 = vst [vmem:[%s815_s3] sm:$0xff] %v354_v29  ;;  %v339_v32 = vmul.f32 0.6931472, %v623_v30 }
 0x1e3   :  { %v357_v34 = vmul.f32 4.3429446, %v341_v31 }
 0x1e4   :  { %v356_v36 = vmul.f32 4.3429446, %v339_v32  ;;  %v166_v37 = vpop.permute.xlu1 %165 }
 0x1e5   :  { %398 = vst [vmem:[%s815_s3 + $0x18] sm:$0xff] %v357_v34  ;;  %v169_v38 = vsub.f32 %v157_v11, %v166_v37 }
 0x1e6   :  { %397 = vst [vmem:[%s815_s3 + $0x10] sm:$0xff] %v356_v36 }
 0x1e7   :  { %v178_v41 = vmul.f32 %v169_v38, %v169_v38  ;;  %v174_v53 = vsel %vm173_vm2, %v163_v33, %v169_v38 }
 0x1e8   :  { %v168_v42 = vpop.permute.xlu1 %167 }
 0x1e9   :  { %v180_v43 = vadd.f32 %v178_v41, %v176_v39  ;;  %v170_v44 = vsub.f32 %v158_v13, %v168_v42 }
 0x1eb   :  { %v179_v46 = vmul.f32 %v170_v44, %v170_v44  ;;  %vm182_vm0 = vcmp.gt.f32.partialorder %v180_v43, 0.0  ;;  %v175_v59 = vsel %vm173_vm2, %v164_v40, %v170_v44 }
 0x1ec   :  { %v184_v48 = vsel %vm182_vm0, %v180_v43, 1.0 }
 0x1ed   :  { %v181_v49 = vadd.f32 %v179_v46, %v177_v45  ;;  %624 = vrsqrt.f32 %v184_v48 }
 0x1ef   :  { %vm183_vm1 = vcmp.gt.f32.partialorder %v181_v49, 0.0 }
 0x1f0   :  { %v185_v51 = vsel %vm183_vm1, %v181_v49, 1.0 }
 0x1f1   :  { %626 = vrsqrt.f32 %v185_v51 }
 0x1f2   :  { %628 = vlog2.f32 %v329_v63 }
 0x1f3   :  { %630 = vlog2.f32 %v328_v1 }
 0x1f4   :  { %632 = vlog2.f32 %v331_v3 }
 0x1f5   :  { %634 = vlog2.f32 %v330_v5 }
 0x1f7   :  { %v625_v52 = vpop.eup %624 }
 0x1f8   :  { %v188_v56 = vmul.f32 %v625_v52, %v174_v53 }
 0x1fa   :  { %v191_v57 = vsel %vm182_vm0, %v188_v56, %v190_v55 }
 0x1fb   :  { %v627_v58 = vpop.eup %626  ;;  %547 = vmatprep.mubr.f32.mxu1 %v191_v57 }
 0x1fc   :  { %v189_v60 = vmul.f32 %v627_v58, %v175_v59  ;;  %v629_v6 = vpop.eup %628 }
 0x1fd   :  { %v631_v7 = vpop.eup %630  ;;  %v345_v8 = vmul.f32 0.6931472, %v629_v6 }
 0x1fe   :  { %v192_v61 = vsel %vm183_vm1, %v189_v60, %v190_v55  ;;  %v343_v9 = vmul.f32 0.6931472, %v631_v7  ;;  %v633_v11 = vpop.eup %632 }
 0x1ff   :  { %548 = vmatmul.mubr.f32.gmra.mrb[8].mxu1 %v192_v61  ;;  %v359_v10 = vmul.f32 4.3429446, %v345_v8  ;;  %v635_v13 = vpop.eup %634  ;;  %v349_v14 = vmul.f32 0.6931472, %v633_v11 }
 0x200   :  { %v358_v12 = vmul.f32 4.3429446, %v343_v9  ;;  %v347_v15 = vmul.f32 0.6931472, %v635_v13 }
 0x201   :  { %400 = vst [vmem:[%s815_s3 + $0x28] sm:$0xff] %v359_v10  ;;  %v361_v16 = vmul.f32 4.3429446, %v349_v14 }
 0x202   :  { %399 = vst [vmem:[%s815_s3 + $0x20] sm:$0xff] %v358_v12  ;;  %v360_v17 = vmul.f32 4.3429446, %v347_v15 }
 0x203   :  { %402 = vst [vmem:[%s815_s3 + $0x38] sm:$0xff] %v361_v16 }
 0x204   :  { %401 = vst [vmem:[%s815_s3 + $0x30] sm:$0xff] %v360_v17 }
 0x2d2   :  { %v549_v18 = vpop.f32.mrb[8].mxu1 }
 0x2d3   :  { %404 = vst [vmem:[%s815_s3 + $0x48] sm:$0xff] %v549_v18  ;;  %v315_v19 = vpop.f32.mrb[9].mxu1 }
 0x2d4   :  { %403 = vst [vmem:[%s815_s3 + $0x40] sm:$0xff] %v315_v19 }

</bundles_post_ra>
